<compile_context>
chip_gen: v7x
topology: tpu7x:2x2x1
jax: 0.10.0
libtpu: 0.0.40
codegen_flags: <defaults>
</compile_context>

<pallas_src>
import jax
import jax.numpy as jnp
from jax.experimental import pallas as pl
from jax.experimental.pallas import tpu as pltpu


def _round_up(n, m):
    return ((n + m - 1) // m) * m


def _vmem_cap_bytes():
    """Per-TensorCore VMEM capacity (128 MiB v5e/v6e, 64 MiB v7x)."""
    try:
        cap = int(getattr(pltpu.get_tpu_info(), "vmem_capacity_bytes", 0))
        if cap > 0:
            return cap
    except Exception:
        pass
    return 64 << 20  # conservative fallback (v7x per-TC)


def _choose_tf(d_model, d_ff):
    """d_ff streaming chunk: multiple of 128 lanes, minimal d_ff padding, and
    small enough that double-buffered bf16 W1+W2 chunks stay under ~16 MiB."""
    budget = 16 << 20
    cands = [c for c in (2048, 1024, 512, 256, 128)
             if 4 * d_model * c * 2 <= budget]
    if not cands:
        cands = [128]
    return min(cands, key=lambda c: (_round_up(d_ff, c), -c))


def _vmem_need(tm, tf, d_model, x_bytes, out_bytes):
    """Rough per-TC VMEM bytes: pipeline buffers + scratch + intermediates."""
    return (2 * tm * d_model * x_bytes        # x row tiles (double-buffered)
            + 2 * tm * d_model * out_bytes    # out row tiles (double-buffered)
            + 4 * d_model * tf * 2            # W1 + W2 chunks (bf16, 2 bufs each)
            + 2 * (tf + d_model) * 4          # biases (f32, 2 bufs)
            + tm * d_model * 4                # f32 accumulator scratch
            + tm * tf * 6                     # ReLU intermediate (f32 + bf16)
            + tm * d_model * 2)               # bf16 cast of the x tile


def _choose_tm(M, d_model, tf, x_bytes, out_bytes, usable_vmem):
    if M <= 512:
        return M                              # single row tile (full-dim block)
    tm = 512                                  # 16-aligned (bf16) & MXU-height multiple
    while tm > 128 and _vmem_need(tm, tf, d_model, x_bytes, out_bytes) > usable_vmem:
        tm //= 2
    return tm


def ffn_kernel(x_ref, w1_ref, b1_ref, w2_ref, b2_ref, o_ref, acc_ref):
    # x_ref :(TM, Dm) x.dtype   w1_ref:(Dm, TF) bf16   b1_ref:(1, TF) f32
    # w2_ref:(TF, Dm) bf16      b2_ref:(1, Dm) f32     o_ref :(TM, Dm)
    # acc_ref:(TM, Dm) f32 scratch, resident across the k (d_ff) axis.
    k = pl.program_id(1)

    @pl.when(k == 0)
    def _():
        acc_ref[...] = jnp.zeros_like(acc_ref)

    xb = x_ref[...].astype(jnp.bfloat16)              # in-kernel cast (free under MXU)
    h = jnp.dot(xb, w1_ref[...], preferred_element_type=jnp.float32)
    h = jnp.maximum(h + b1_ref[...], 0.0).astype(jnp.bfloat16)   # ReLU -> bf16
    # dropout (eval mode) == identity
    acc_ref[...] += jnp.dot(h, w2_ref[...], preferred_element_type=jnp.float32)

    @pl.when(k == pl.num_programs(1) - 1)
    def _():
        o_ref[...] = (acc_ref[...] + b2_ref[...]).astype(o_ref.dtype)


def prepare_ffn_params(w1, b1, w2, b2, tf=None):
    """One-time parameter prep (outside the hot path): cast weights to bf16,
    biases to f32, pad d_ff to a multiple of the streaming chunk `tf`.
    W1:(d_model, d_ff), W2:(d_ff, d_model) — already transposed vs torch
    Linear.weight.  Returns (w1p, b1p, w2p, b2p, tf)."""
    d_model, d_ff = w1.shape
    if tf is None:
        tf = _choose_tf(d_model, d_ff)
    df_p = _round_up(d_ff, tf)
    pad = df_p - d_ff
    w1p = jnp.pad(w1.astype(jnp.bfloat16), ((0, 0), (0, pad)))
    w2p = jnp.pad(w2.astype(jnp.bfloat16), ((0, pad), (0, 0)))
    b1p = jnp.pad(b1.reshape(1, d_ff).astype(jnp.float32), ((0, 0), (0, pad)))
    b2p = b2.reshape(1, d_model).astype(jnp.float32)
    return w1p, b1p, w2p, b2p, tf


def positionwise_ffn(x, w1p, b1p, w2p, b2p, tf, *, tm=None):
    """Fused FFN: relu(x @ W1 + b1) @ W2 + b2 (dropout = identity, eval mode).

    x: (B, S, d_model).  Params must come from prepare_ffn_params().
    Returns (B, S, d_model) in x.dtype.
    """
    B, S, d_model = x.shape
    df_p = w1p.shape[1]
    assert df_p % tf == 0 and w2p.shape == (df_p, d_model)
    M = B * S
    n_k = df_p // tf

    x_bytes = x.dtype.itemsize
    out_bytes = x.dtype.itemsize
    cap = _vmem_cap_bytes()
    usable = int(cap * 0.9)
    tm_eff = tm if tm is not None else _choose_tm(M, d_model, tf, x_bytes,
                                                  out_bytes, usable)
    n_m = pl.cdiv(M, tm_eff)

    x2d = x.reshape(M, d_model)            # metadata-only; no extra HBM pass

    need = _vmem_need(tm_eff, tf, d_model, x_bytes, out_bytes)
    vmem_limit = max(16 << 20, min(int(need * 1.25) + (4 << 20), usable))

    w_reads = n_m if n_k > 1 else 1        # chunks re-stream once per row tile
    cost = pl.CostEstimate(
        flops=4 * M * d_model * df_p,      # two matmuls: 2*M*Dm*Df each
        transcendentals=0,
        bytes_accessed=(x2d.size * x_bytes
                        + (w1p.size + w2p.size) * 2 * w_reads
                        + (b1p.size + b2p.size) * 4
                        + M * d_model * out_bytes),
    )

    out2d = pl.pallas_call(
        ffn_kernel,
        out_shape=jax.ShapeDtypeStruct((M, d_model), x.dtype),
        grid_spec=pltpu.PrefetchScalarGridSpec(
            num_scalar_prefetch=0,
            grid=(n_m, n_k),
            in_specs=[
                pl.BlockSpec((tm_eff, d_model), lambda i, k: (i, 0)),  # x row tile
                pl.BlockSpec((d_model, tf), lambda i, k: (0, k)),      # W1 chunk
                pl.BlockSpec((1, tf), lambda i, k: (0, k)),            # b1 chunk
                pl.BlockSpec((tf, d_model), lambda i, k: (k, 0)),      # W2 chunk
                pl.BlockSpec((1, d_model), lambda i, k: (0, 0)),       # b2 resident
            ],
            out_specs=pl.BlockSpec((tm_eff, d_model), lambda i, k: (i, 0)),
            scratch_shapes=[pltpu.VMEM((tm_eff, d_model), jnp.float32)],
        ),
        compiler_params=pltpu.CompilerParams(
            dimension_semantics=("parallel", "arbitrary"),
            vmem_limit_bytes=vmem_limit,
        ),
        cost_estimate=cost,
    )(x2d, w1p, b1p, w2p, b2p)

    return out2d.reshape(B, S, d_model)


def init_params(key, d_model, d_ff, dtype=jnp.float32):
    """Deterministic init mimicking nn.Linear default (uniform +-1/sqrt(fan_in)).
    Stored already transposed for the kernel: W1:(d_model,d_ff), W2:(d_ff,d_model)."""
    k1, k2, k3, k4 = jax.random.split(key, 4)
    bound1 = 1.0 / (d_model ** 0.5)
    bound2 = 1.0 / (d_ff ** 0.5)
    w1 = jax.random.uniform(k1, (d_model, d_ff), dtype, -bound1, bound1)
    b1 = jax.random.uniform(k2, (d_ff,), dtype, -bound1, bound1)
    w2 = jax.random.uniform(k3, (d_ff, d_model), dtype, -bound2, bound2)
    b2 = jax.random.uniform(k4, (d_model,), dtype, -bound2, bound2)
    return w1, b1, w2, b2


def ffn_reference(x, w1, b1, w2, b2):
    """bf16-matched plain-JAX reference (eval-mode dropout = identity)."""
    B, S, d_model = x.shape
    xb = x.reshape(-1, d_model).astype(jnp.bfloat16)
    h = jnp.dot(xb, w1.astype(jnp.bfloat16),
                preferred_element_type=jnp.float32) + b1
    h = jnp.maximum(h, 0.0).astype(jnp.bfloat16)
    y = jnp.dot(h, w2.astype(jnp.bfloat16),
                preferred_element_type=jnp.float32) + b2
    return y.reshape(B, S, d_model)


if __name__ == "__main__":
    key = jax.random.PRNGKey(0)
    kx, kp, kx2, kp2 = jax.random.split(key, 4)

    # Test 1: small shapes implied by the module (single row tile, one d_ff chunk).
    B, S, d_model, d_ff = 2, 8, 32, 64
    x = jax.random.normal(kx, (B, S, d_model), jnp.float32)
    w1, b1, w2, b2 = init_params(kp, d_model, d_ff)
    params = prepare_ffn_params(w1, b1, w2, b2)
    y = jax.block_until_ready(positionwise_ffn(x, *params))
    ref = ffn_reference(x, w1, b1, w2, b2)
    assert jnp.allclose(y, ref, atol=2e-2, rtol=2e-2), "mismatch vs reference (test 1)"

    # Test 2: exercise the multi-chunk d_ff reduction (accumulator path),
    # d_ff zero-padding, and a ragged last row tile (M=40 with TM=16).
    B2, S2, dm2, dff2 = 2, 20, 32, 320
    x2 = jax.random.normal(kx2, (B2, S2, dm2), jnp.float32)
    p2 = init_params(kp2, dm2, dff2)
    prep2 = prepare_ffn_params(*p2, tf=128)
    y2 = jax.block_until_ready(positionwise_ffn(x2, *prep2, tm=16))
    ref2 = ffn_reference(x2, *p2)
    assert jnp.allclose(y2, ref2, atol=2e-2, rtol=2e-2), "mismatch vs reference (test 2)"

    print("KERNEL_OK")
</pallas_src>

<mosaic_0001>
module attributes {stable_mosaic.version = 11 : i64} {
  func.func @ffn_kernel(%arg0: i32, %arg1: i32, %arg2: memref<16x32xf32, #tpu.memory_space<vmem>>, %arg3: memref<32x128xbf16, #tpu.memory_space<vmem>>, %arg4: memref<1x128xf32, #tpu.memory_space<vmem>>, %arg5: memref<128x32xbf16, #tpu.memory_space<vmem>>, %arg6: memref<1x32xf32, #tpu.memory_space<vmem>>, %arg7: memref<16x32xf32, #tpu.memory_space<vmem>>, %arg8: memref<16x32xf32, #tpu.memory_space<vmem>>) attributes {dimension_semantics = [#tpu.dimension_semantics<parallel>, #tpu.dimension_semantics<arbitrary>], iteration_bounds = array<i64: 1, 1>, scalar_prefetch = 0 : i64, scratch_operands = 1 : i64, tpu.core_type = #tpu.core_type<tc>, window_params = [{transform_indices = @transform_0, window_bounds = array<i64: 16, 32>}, {transform_indices = @transform_1, window_bounds = array<i64: 32, 128>}, {transform_indices = @transform_2, window_bounds = array<i64: 1, 128>}, {transform_indices = @transform_3, window_bounds = array<i64: 128, 32>}, {pipeline_mode = #tpu.pipeline_mode<synchronous>, transform_indices = @transform_4, window_bounds = array<i64: 1, 32>}, {transform_indices = @transform_5, window_bounds = array<i64: 16, 32>}]} {
    %c0_i32 = arith.constant 0 : i32
    %0 = arith.cmpi eq, %arg1, %c0_i32 : i32
    %1 = arith.extui %0 : i1 to i32
    %c0_i32_0 = arith.constant 0 : i32
    %2 = arith.cmpi ne, %1, %c0_i32_0 : i32
    scf.if %2 {
      %cst_16 = arith.constant 0.000000e+00 : f32
      %21 = vector.broadcast %cst_16 : f32 to vector<16x32xf32>
      %c0_17 = arith.constant 0 : index
      %c0_18 = arith.constant 0 : index
      %22 = vector.load %arg8[%c0_17, %c0_18] : memref<16x32xf32, #tpu.memory_space<vmem>>, vector<16x32xf32>
      tpu.vector_store %arg8[%c0_17, %c0_18], %21 {strides = array<i32>} : memref<16x32xf32, #tpu.memory_space<vmem>>, vector<16x32xf32>,
    } else {
    }
    %c0 = arith.constant 0 : index
    %c0_1 = arith.constant 0 : index
    %3 = vector.load %arg2[%c0, %c0_1] : memref<16x32xf32, #tpu.memory_space<vmem>>, vector<16x32xf32>
    %4 = arith.truncf %3 : vector<16x32xf32> to vector<16x32xbf16>
    %c0_2 = arith.constant 0 : index
    %c0_3 = arith.constant 0 : index
    %5 = vector.load %arg3[%c0_2, %c0_3] : memref<32x128xbf16, #tpu.memory_space<vmem>>, vector<32x128xbf16>
    %cst = arith.constant dense<0.000000e+00> : vector<16x128xf32>
    %6 = tpu.matmul %4, %5, %cst {dimension_numbers = #tpu.dot_dimension_numbers<[1], [0], [0], [1], [0, 0, 1, 1], [], []>} : vector<16x32xbf16>, vector<32x128xbf16>, vector<16x128xf32> -> vector<16x128xf32>
    %c0_4 = arith.constant 0 : index
    %c0_5 = arith.constant 0 : index
    %7 = vector.load %arg4[%c0_4, %c0_5] : memref<1x128xf32, #tpu.memory_space<vmem>>, vector<1x128xf32>
    %8 = vector.broadcast %7 : vector<1x128xf32> to vector<16x128xf32>
    %9 = arith.addf %6, %8 : vector<16x128xf32>
    %cst_6 = arith.constant 0.000000e+00 : f32
    %10 = vector.broadcast %cst_6 : f32 to vector<16x128xf32>
    %11 = arith.maximumf %9, %10 : vector<16x128xf32>
    %12 = arith.truncf %11 : vector<16x128xf32> to vector<16x128xbf16>
    %c0_7 = arith.constant 0 : index
    %c0_8 = arith.constant 0 : index
    %13 = vector.load %arg8[%c0_7, %c0_8] : memref<16x32xf32, #tpu.memory_space<vmem>>, vector<16x32xf32>
    %c0_9 = arith.constant 0 : index
    %c0_10 = arith.constant 0 : index
    %14 = vector.load %arg5[%c0_9, %c0_10] : memref<128x32xbf16, #tpu.memory_space<vmem>>, vector<128x32xbf16>
    %cst_11 = arith.constant dense<0.000000e+00> : vector<16x32xf32>
    %15 = tpu.matmul %12, %14, %cst_11 {dimension_numbers = #tpu.dot_dimension_numbers<[1], [0], [0], [1], [0, 0, 1, 1], [], []>} : vector<16x128xbf16>, vector<128x32xbf16>, vector<16x32xf32> -> vector<16x32xf32>
    %16 = arith.addf %13, %15 : vector<16x32xf32>
    %c0_12 = arith.constant 0 : index
    %c0_13 = arith.constant 0 : index
    %17 = vector.load %arg8[%c0_12, %c0_13] : memref<16x32xf32, #tpu.memory_space<vmem>>, vector<16x32xf32>
    tpu.vector_store %arg8[%c0_12, %c0_13], %16 {strides = array<i32>} : memref<16x32xf32, #tpu.memory_space<vmem>>, vector<16x32xf32>,
    %c0_i32_14 = arith.constant 0 : i32
    %18 = arith.cmpi eq, %arg1, %c0_i32_14 : i32
    %19 = arith.extui %18 : i1 to i32
    %c0_i32_15 = arith.constant 0 : i32
    %20 = arith.cmpi ne, %19, %c0_i32_15 : i32
    scf.if %20 {
      %c0_16 = arith.constant 0 : index
      %c0_17 = arith.constant 0 : index
      %21 = vector.load %arg8[%c0_16, %c0_17] : memref<16x32xf32, #tpu.memory_space<vmem>>, vector<16x32xf32>
      %c0_18 = arith.constant 0 : index
      %c0_19 = arith.constant 0 : index
      %22 = vector.load %arg6[%c0_18, %c0_19] : memref<1x32xf32, #tpu.memory_space<vmem>>, vector<1x32xf32>
      %23 = vector.broadcast %22 : vector<1x32xf32> to vector<16x32xf32>
      %24 = arith.addf %21, %23 : vector<16x32xf32>
      %c0_20 = arith.constant 0 : index
      %c0_21 = arith.constant 0 : index
      %25 = vector.load %arg7[%c0_20, %c0_21] : memref<16x32xf32, #tpu.memory_space<vmem>>, vector<16x32xf32>
      tpu.vector_store %arg7[%c0_20, %c0_21], %24 {strides = array<i32>} : memref<16x32xf32, #tpu.memory_space<vmem>>, vector<16x32xf32>,
    } else {
    }
    return
  }
  func.func @transform_0(%arg0: i32, %arg1: i32) -> (i32, i32) {
    %c0_i32 = arith.constant 0 : i32
    %c0_i32_0 = arith.constant 0 : i32
    return %arg0, %c0_i32 : i32, i32
  }
  func.func @transform_1(%arg0: i32, %arg1: i32) -> (i32, i32) {
    %c0_i32 = arith.constant 0 : i32
    %c0_i32_0 = arith.constant 0 : i32
    return %c0_i32, %arg1 : i32, i32
  }
  func.func @transform_2(%arg0: i32, %arg1: i32) -> (i32, i32) {
    %c0_i32 = arith.constant 0 : i32
    %c0_i32_0 = arith.constant 0 : i32
    return %c0_i32, %arg1 : i32, i32
  }
  func.func @transform_3(%arg0: i32, %arg1: i32) -> (i32, i32) {
    %c0_i32 = arith.constant 0 : i32
    %c0_i32_0 = arith.constant 0 : i32
    return %arg1, %c0_i32 : i32, i32
  }
  func.func @transform_4(%arg0: i32, %arg1: i32) -> (i32, i32) {
    %c0_i32 = arith.constant 0 : i32
    %c0_i32_0 = arith.constant 0 : i32
    %c0_i32_1 = arith.constant 0 : i32
    return %c0_i32, %c0_i32_0 : i32, i32
  }
  func.func @transform_5(%arg0: i32, %arg1: i32) -> (i32, i32) {
    %c0_i32 = arith.constant 0 : i32
    %c0_i32_0 = arith.constant 0 : i32
    return %arg0, %c0_i32 : i32, i32
  }
}

</mosaic_0001>

<bundles_post_ra>
// kernel: tpu_custom_call.1
= control target key start
LH: loop header
LB: loop body
LE: loop exit
PB: predicated region body
PF: predicated region fallthrough
CT: control target
= control target key end

     0   :  { %v338_v1 = vmov 0.0   ;;  %vm339_vm0 = vmmov 0   ;;  %vm26_vm1 = vcmask 261120   ;;  %s434_s0 = inlined_call_operand.vmem [shape: f32[16,32], index: 0, kind: input, shape index: {}]   ;;  %s435_s1 = inlined_call_operand.vmem [shape: bf16[32,128], index: 1, kind: input, shape index: {}]   ;;  %s436_s2 = inlined_call_operand.vmem [shape: f32[1,128], index: 2, kind: input, shape index: {}]   ;;  %s437_s3 = inlined_call_operand.vmem [shape: bf16[128,32], index: 3, kind: input, shape index: {}]   ;;  %s438_s4 = inlined_call_operand.vmem [shape: f32[1,32], index: 4, kind: input, shape index: {}]   ;;  %s439_s5 = inlined_call_operand.hbm [shape: f32[16,32], index: 5, kind: output, shape index: {}]  }
   0x1   :  { %v304_v0 = vld [vmem:[%s435_s1] sm:$0xff]   ;;  %271 = vmatprep.subr.bf16.mxu0 %v338_v1  ;;  %v305_v2 = vld [vmem:[%s435_s1 + $0x8] sm:$0xff]   ;;  %279 = vmatprep.subr.bf16.mxu1 %v338_v1  ;;  %27 = vst.msk [vmem:[#allocation2] sm:$0xff] %vm26_vm1, %v338_v1  ;;  %28 = vst.msk [vmem:[#allocation2 + $0x8] sm:$0xff] %vm26_vm1, %v338_v1 }
   0x2   :  { %272 = vmatpush3.bf16.msra.mxu0 %v304_v0  ;;  %275 = vmatprep.mubr.msk.bf16.mxu0 %vm339_vm0, %v338_v1  ;;  %v29_v3 = vld [vmem:[%s434_s0] sm:$0xff]  ;;  %v30_v4 = vld [vmem:[%s434_s0 + $0x8] sm:$0xff]  ;;  %v308_v8 = vld [vmem:[%s437_s3 + $0x10] sm:$0xff]  }
   0x3   :  { %273 = vmatprep.subr.bf16.mxu0 %v338_v1  ;;  %v306_v5 = vld [vmem:[%s437_s3] sm:$0xff]   ;;  %295 = vmatprep.mubr.msk.bf16.mxu1 %vm339_vm0, %v338_v1  ;;  %v31_v6 = vpack.c.bf16 %v30_v4, %v29_v3  ;;  %v307_v7 = vld [vmem:[%s437_s3 + $0x8] sm:$0xff]  }
   0x4   :  { %280 = vmatpush3.bf16.msra.mxu1 %v306_v5 }
   0x5   :  { %281 = vmatprep.subr.bf16.mxu1 %v338_v1 }
   0x6   :  { %274 = vmatpush3.bf16.msra.mxu0 %v305_v2 }
   0x8   :  { %282 = vmatpush3.bf16.msra.mxu1 %v307_v7 }
   0x9   :  { %276 = vmatmul.mubr.msk.bf16.vlgmr.msra.gmra.mrb[0].mxu0 %vm26_vm1, %v31_v6  ;;  %283 = vmatprep.subr.bf16.mxu1 %v338_v1 }
   0xa   :  { %10 = vsyncpa [#allocation4], 0  ;;  %v309_v9 = vld [vmem:[%s437_s3 + $0x18] sm:$0xff]   ;;  %v310_v10 = vld [vmem:[%s437_s3 + $0x20] sm:$0xff]   ;;  %s340_s17 = smov [#allocation3]  }
   0xb   :  { %v311_v11 = vld [vmem:[%s437_s3 + $0x28] sm:$0xff]   ;;  %v312_v12 = vld [vmem:[%s437_s3 + $0x30] sm:$0xff]   ;;  %v313_v13 = vld [vmem:[%s437_s3 + $0x38] sm:$0xff]   ;;  %s235_s18 = sshll.u32 %s340_s17, 4  ;;  %s236_s18 = int_to_ptr.vmem [resolvable:$true] %s235_s18 }
   0xc   :  { %284 = vmatpush3.bf16.msra.mxu1 %v308_v8  ;;  %v246_v14 = vld [vmem:[%s436_s2] ss:$0 sm:$0xff]  ;;  %v104_v26 = vld [vmem:[#allocation2 + $0x8] sm:$0xff]  ;;  %s314_s19 = scalar_lea.vmem %s236_s18, 256  ;;  %p319_p1 = scmp.lt.s32.totalorder %s236_s18, %s236_s18 }
   0xd   :  { %285 = vmatprep.subr.bf16.mxu1 %v338_v1  ;;  %v103_v24 = vld [vmem:[#allocation2] sm:$0xff]  ;;  %p315_p0 = scmp.ne.s32.totalorder %s236_s18, %s314_s19  ;;  %p320_p2 = scmp.lt.s32.totalorder %s314_s19, %s314_s19 }
   0xe   :  { %v258_v32 = vld [vmem:[%s438_s4] ss:$0 sm:$0xff] }
   0xf   :  { %p321_p3 = por %p320_p2, %p319_p1 }
  0x10   :  { %286 = vmatpush3.bf16.msra.mxu1 %v309_v9 }
  0x11   :  { %287 = vmatprep.subr.bf16.mxu1 %v338_v1  ;;  %p322_p4 = pnand %p321_p3, %p315_p0 }
  0x14   :  { %288 = vmatpush3.bf16.msra.mxu1 %v310_v10 }
  0x15   :  { %289 = vmatprep.subr.bf16.mxu1 %v338_v1 }
  0x18   :  { %290 = vmatpush3.bf16.msra.mxu1 %v311_v11 }
  0x19   :  { %291 = vmatprep.subr.bf16.mxu1 %v338_v1 }
  0x1c   :  { %292 = vmatpush3.bf16.msra.mxu1 %v312_v12 }
  0x1d   :  { %293 = vmatprep.subr.bf16.mxu1 %v338_v1 }
  0x20   :  { %294 = vmatpush3.bf16.msra.mxu1 %v313_v13 }
  0xdc   :  { %v93_v15 = vpop.f32.mrb[0].mxu0 }
  0xdd   :  { %v94_v16 = vadd.f32 %v246_v14, %v93_v15  ;;  %v277_v17 = vpop.f32.mrb[1].mxu0 }
  0xde   :  { %v96_v18 = vpop.f32.mrb[2].mxu0 }
  0xdf   :  { %v97_v19 = vadd.f32 %v246_v14, %v96_v18  ;;  %v278_v20 = vpop.f32.mrb[3].mxu0  ;;  %v100_v21 = vmax.f32 %v94_v16, 0.0 }
  0xe1   :  { %v101_v22 = vmax.f32 %v97_v19, 0.0 }
  0xe3   :  { %v102_v23 = vpack.c.bf16 %v101_v22, %v100_v21 }
  0xe5   :  { %296 = vmatmul.mubr.bf16.vlgmr.msra.gmra.mrb[0].mxu1 %v102_v23 }
 0x1b8   :  { %v203_v25 = vpop.f32.mrb[0].mxu1 }
 0x1b9   :  { %v210_v27 = vadd.f32 %v203_v25, %v103_v24  ;;  %v297_v28 = vpop.f32.mrb[1].mxu1 }
 0x1ba   :  { %v206_v29 = vpop.f32.mrb[2].mxu1 }
 0x1bb   :  { %212 = vst.msk [vmem:[#allocation2] sm:$0xff] %vm26_vm1, %v210_v27  ;;  %v211_v30 = vadd.f32 %v206_v29, %v104_v26  ;;  %v298_v31 = vpop.f32.mrb[3].mxu1 }
 0x1bd   :  { %213 = vst.msk [vmem:[#allocation2 + $0x8] sm:$0xff] %vm26_vm1, %v211_v30 }
 0x1c2   :  { %v217_v33 = vld [vmem:[#allocation2] sm:$0xff] }
 0x1c3   :  { %v226_v34 = vadd.f32 %v258_v32, %v217_v33 }
 0x1c4   :  { %v218_v35 = vld [vmem:[#allocation2 + $0x8] sm:$0xff] }
 0x1c5   :  { %v227_v36 = vadd.f32 %v258_v32, %v218_v35  ;;  %228 = vst.msk [vmem:[#allocation3] sm:$0xff] %vm26_vm1, %v226_v34 }
 0x1c7   :  { %229 = vst.msk [vmem:[#allocation3 + $0x8] sm:$0xff] %vm26_vm1, %v227_v36 }
 0x1c8   :  { %325 = shalt.err (!%p322_p4)
}
 0x1c9   :  { %s326_s21 = scalar_lea.hbm %s439_s5, 256 }
 0x1ca   :  { %p327_p5 = scmp.ne.s32.totalorder %s439_s5, %s326_s21  ;;  %p330_p6 = scmp.lt.u32.totalorder %s326_s21, %s439_s5 }
 0x1cc   :  { %p332_p7 = pnand %p330_p6, %p327_p5 }
 0x1ce   :  { %335 = shalt.err (!%p332_p7)
}
 0x1cf   :  { %s341_s26 = smov 128   ;;  %s342_s1 = smov 8  }
 0x1d0   :  { %241 = dma.vmem_to_hbm [thread:$0]  %s236_s18, 256, %s439_s5, [#allocation4], %s341_s26, %s341_s26, %s342_s1  }
 0x1d1   :  { %336 = dma.done.wait [#allocation4], 256  }
 0x1d2   :  { %337 = vsyncadd [#allocation4], 4294967040 }
 0x1d3   :  { %245 = vsyncpa [#allocation4], 1 }

</bundles_post_ra>
